<compile_context>
chip_gen: v5e
topology: v5e:2x2
jax: 0.10.0
libtpu: 0.0.40
codegen_flags: <defaults>
</compile_context>

<pallas_src>
import functools

import jax
import jax.numpy as jnp
from jax.experimental import pallas as pl
from jax.experimental.pallas import tpu as pltpu

# ----------------------------- config ---------------------------------------
IN_SPLITS = [3, 5, 4]          # per-component input sizes
NUM_HIDDEN = 32                # conf['num_hidden'] (small for this demo)
NUM_OUT = 1                    # num_out
OUTPUT_NOISE = True            # conf['output_noise']
BN_EPS = 1e-5
BATCH = 200                    # demo batch (not a multiple of the tile on purpose)
TILE_B = 128                   # rows per grid step


def _softplus(x):
    # PyTorch Softplus(beta=1, threshold=20): linear above the threshold.
    sp = jnp.maximum(x, 0.0) + jnp.log1p(jnp.exp(-jnp.abs(x)))
    return jnp.where(x > 20.0, x, sp)


def _round_up(n, m):
    return ((n + m - 1) // m) * m


# ----------------------------- kernel ----------------------------------------
def conditional_net_kernel(x_ref, wc_ref, w1_ref, w2_ref, wh_ref, pack_ref,
                           out_ref, *, h_dim, num_out, output_noise):
    ch_pad = wc_ref.shape[1]
    out_dim = out_ref.shape[1]

    x = x_ref[...]

    # packed shift vectors (one row each, loaded once per grid step)
    sh0 = pack_ref[0:1, :ch_pad]        # component-layer shift (zero in padding)
    sh1 = pack_ref[1:2, :h_dim]         # common layer 1 shift
    sh2 = pack_ref[2:3, :h_dim]         # common layer 2 shift
    bh = pack_ref[3:4, :out_dim]        # fused head bias

    # component layers: block-diagonal Linear (BN folded into W) -> ReLU
    h = jnp.maximum(
        jnp.dot(x, wc_ref[...], preferred_element_type=jnp.float32) + sh0, 0.0)
    # common layer 1: Linear (BN folded) -> ReLU
    h = jnp.maximum(
        jnp.dot(h, w1_ref[...], preferred_element_type=jnp.float32) + sh1, 0.0)
    # common layer 2: Linear (BN folded) -> ReLU
    h = jnp.maximum(
        jnp.dot(h, w2_ref[...], preferred_element_type=jnp.float32) + sh2, 0.0)

    # fused heads: [mu | sigma2] in one matmul, softplus only on sigma lanes
    y = jnp.dot(h, wh_ref[...], preferred_element_type=jnp.float32) + bh
    if output_noise:
        lane = jax.lax.broadcasted_iota(jnp.int32, y.shape, 1)
        y = jnp.where(lane >= num_out, _softplus(y), y)

    out_ref[...] = y                    # single full-tile store


# ----------------------------- parameters ------------------------------------
def _linear_init(key, fan_in, fan_out):
    """PyTorch-style nn.Linear init: U(-1/sqrt(fan_in), 1/sqrt(fan_in))."""
    kw, kb = jax.random.split(key)
    bound = 1.0 / jnp.sqrt(jnp.float32(fan_in))
    w = jax.random.uniform(kw, (fan_out, fan_in), jnp.float32, -bound, bound)
    b = jax.random.uniform(kb, (fan_out,), jnp.float32, -bound, bound)
    return w, b


def init_params(key):
    """Build BN-folded, head-fused, lane-padded parameters."""
    C, H, D = len(IN_SPLITS), NUM_HIDDEN, sum(IN_SPLITS)
    CH = C * H
    CH_PAD = _round_up(CH, 128)          # lane-align the component output width
    keys = jax.random.split(key, C + 4)

    # inference BN with fresh running stats: scale = gamma/sqrt(var+eps)
    bn_scale = 1.0 / jnp.sqrt(jnp.float32(1.0) + BN_EPS)

    # --- component layers: block-diagonal weight, BN folded, zero-padded -----
    wc = jnp.zeros((D, CH_PAD), jnp.float32)
    sh0 = jnp.zeros((CH_PAD,), jnp.float32)
    row = 0
    for i, d in enumerate(IN_SPLITS):
        w_i, b_i = _linear_init(keys[i], d, H)                     # (H, d), (H,)
        wc = wc.at[row:row + d, i * H:(i + 1) * H].set(w_i.T * bn_scale)
        sh0 = sh0.at[i * H:(i + 1) * H].set(b_i * bn_scale)
        row += d

    # --- common layers (BN folded); w1 rows zero-padded to CH_PAD ------------
    w1_raw, b1 = _linear_init(keys[C], CH, H)                      # (H, CH)
    w1 = jnp.zeros((CH_PAD, H), jnp.float32).at[:CH, :].set(w1_raw.T * bn_scale)
    sh1 = b1 * bn_scale

    w2_raw, b2 = _linear_init(keys[C + 1], H, H)
    w2 = w2_raw.T * bn_scale
    sh2 = b2 * bn_scale

    # --- fused heads ----------------------------------------------------------
    wmu, bmu = _linear_init(keys[C + 2], H, NUM_OUT)
    if OUTPUT_NOISE:
        ws, bs = _linear_init(keys[C + 3], H, NUM_OUT)
        wh = jnp.concatenate([wmu.T, ws.T], axis=1)                # (H, 2*NUM_OUT)
        bh = jnp.concatenate([bmu, bs], axis=0)
    else:
        wh = wmu.T
        bh = bmu
    out_dim = wh.shape[1]

    # --- pack all shift / bias vectors into one (8, PACK_W) array ------------
    pack_w = max(CH_PAD, 128)
    pack = jnp.zeros((8, pack_w), jnp.float32)
    pack = pack.at[0, :CH_PAD].set(sh0)
    pack = pack.at[1, :H].set(sh1)
    pack = pack.at[2, :H].set(sh2)
    pack = pack.at[3, :out_dim].set(bh)

    return dict(wc=wc, w1=w1, w2=w2, wh=wh, pack=pack,
                # kept separately only for the pure-JAX reference
                sh0=sh0.reshape(1, -1), sh1=sh1.reshape(1, -1),
                sh2=sh2.reshape(1, -1), bh=bh.reshape(1, -1))


# ----------------------------- wrapper ----------------------------------------
def conditional_net_forward(x, params, tile_b=TILE_B):
    B, D = x.shape
    out_dim = params['wh'].shape[1]

    # pad the batch to a tile multiple; padded rows are sliced off afterwards
    Bp = _round_up(B, tile_b)
    if Bp != B:
        x = jnp.pad(x, ((0, Bp - B), (0, 0)))
    grid = (Bp // tile_b,)

    kern = functools.partial(conditional_net_kernel,
                             h_dim=NUM_HIDDEN,
                             num_out=NUM_OUT,
                             output_noise=OUTPUT_NOISE)

    const = lambda i: (0, 0)   # weights: constant block index -> VMEM-resident

    out = pl.pallas_call(
        kern,
        out_shape=jax.ShapeDtypeStruct((Bp, out_dim), jnp.float32),
        grid=grid,
        in_specs=[
            pl.BlockSpec((tile_b, D), lambda i: (i, 0)),
            pl.BlockSpec(params['wc'].shape, const),
            pl.BlockSpec(params['w1'].shape, const),
            pl.BlockSpec(params['w2'].shape, const),
            pl.BlockSpec(params['wh'].shape, const),
            pl.BlockSpec(params['pack'].shape, const),
        ],
        out_specs=pl.BlockSpec((tile_b, out_dim), lambda i: (i, 0)),
        compiler_params=pltpu.CompilerParams(
            dimension_semantics=("parallel",)),
    )(x, params['wc'], params['w1'], params['w2'], params['wh'],
      params['pack'])

    return out[:B]


# ----------------------------- pure-JAX reference ------------------------------
def reference_forward(x, params):
    h = jnp.maximum(x @ params['wc'] + params['sh0'], 0.0)
    h = jnp.maximum(h @ params['w1'] + params['sh1'], 0.0)
    h = jnp.maximum(h @ params['w2'] + params['sh2'], 0.0)
    y = h @ params['wh'] + params['bh']
    if OUTPUT_NOISE:
        mu = y[:, :NUM_OUT]
        sig = _softplus(y[:, NUM_OUT:])
        y = jnp.concatenate([mu, sig], axis=1)
    return y


if __name__ == "__main__":
    key = jax.random.PRNGKey(0)
    kx, kp = jax.random.split(key)
    x = jax.random.normal(kx, (BATCH, sum(IN_SPLITS)), jnp.float32)
    params = init_params(kp)

    out = conditional_net_forward(x, params)
    out = jax.block_until_ready(out)

    ref = reference_forward(x, params)
    expected_dim = 2 * NUM_OUT if OUTPUT_NOISE else NUM_OUT
    assert out.shape == (BATCH, expected_dim), out.shape
    assert jnp.allclose(out, ref, atol=1e-5, rtol=1e-5), (out, ref)
    print("KERNEL_OK")
</pallas_src>

<mosaic_0001>
module attributes {stable_mosaic.version = 11 : i64} {
  func.func @conditional_net_kernel(%arg0: i32, %arg1: memref<128x12xf32, #tpu.memory_space<vmem>>, %arg2: memref<12x128xf32, #tpu.memory_space<vmem>>, %arg3: memref<128x32xf32, #tpu.memory_space<vmem>>, %arg4: memref<32x32xf32, #tpu.memory_space<vmem>>, %arg5: memref<32x2xf32, #tpu.memory_space<vmem>>, %arg6: memref<8x128xf32, #tpu.memory_space<vmem>>, %arg7: memref<128x2xf32, #tpu.memory_space<vmem>>) attributes {dimension_semantics = [#tpu.dimension_semantics<parallel>], iteration_bounds = array<i64: 2>, scalar_prefetch = 0 : i64, scratch_operands = 0 : i64, tpu.core_type = #tpu.core_type<tc>, window_params = [{transform_indices = @transform_0, window_bounds = array<i64: 128, 12>}, {pipeline_mode = #tpu.pipeline_mode<synchronous>, transform_indices = @transform_1, window_bounds = array<i64: 12, 128>}, {pipeline_mode = #tpu.pipeline_mode<synchronous>, transform_indices = @transform_2, window_bounds = array<i64: 128, 32>}, {pipeline_mode = #tpu.pipeline_mode<synchronous>, transform_indices = @transform_3, window_bounds = array<i64: 32, 32>}, {pipeline_mode = #tpu.pipeline_mode<synchronous>, transform_indices = @transform_4, window_bounds = array<i64: 32, 2>}, {pipeline_mode = #tpu.pipeline_mode<synchronous>, transform_indices = @transform_5, window_bounds = array<i64: 8, 128>}, {transform_indices = @transform_6, window_bounds = array<i64: 128, 2>}]} {
    %c0 = arith.constant 0 : index
    %c0_0 = arith.constant 0 : index
    %0 = vector.load %arg1[%c0, %c0_0] : memref<128x12xf32, #tpu.memory_space<vmem>>, vector<128x12xf32>
    %c0_1 = arith.constant 0 : index
    %c0_2 = arith.constant 0 : index
    %1 = vector.load %arg6[%c0_1, %c0_2] : memref<8x128xf32, #tpu.memory_space<vmem>>, vector<1x128xf32>
    %c1 = arith.constant 1 : index
    %c0_3 = arith.constant 0 : index
    %2 = vector.load %arg6[%c1, %c0_3] : memref<8x128xf32, #tpu.memory_space<vmem>>, vector<1x32xf32>
    %c2 = arith.constant 2 : index
    %c0_4 = arith.constant 0 : index
    %3 = vector.load %arg6[%c2, %c0_4] : memref<8x128xf32, #tpu.memory_space<vmem>>, vector<1x32xf32>
    %c3 = arith.constant 3 : index
    %c0_5 = arith.constant 0 : index
    %4 = vector.load %arg6[%c3, %c0_5] : memref<8x128xf32, #tpu.memory_space<vmem>>, vector<1x2xf32>
    %c0_6 = arith.constant 0 : index
    %c0_7 = arith.constant 0 : index
    %5 = vector.load %arg2[%c0_6, %c0_7] : memref<12x128xf32, #tpu.memory_space<vmem>>, vector<12x128xf32>
    %cst = arith.constant dense<0.000000e+00> : vector<128x128xf32>
    %6 = tpu.matmul %0, %5, %cst {dimension_numbers = #tpu.dot_dimension_numbers<[1], [0], [0], [1], [0, 0, 1, 1], [], []>} : vector<128x12xf32>, vector<12x128xf32>, vector<128x128xf32> -> vector<128x128xf32>
    %7 = vector.broadcast %1 : vector<1x128xf32> to vector<128x128xf32>
    %8 = arith.addf %6, %7 : vector<128x128xf32>
    %cst_8 = arith.constant 0.000000e+00 : f32
    %9 = vector.broadcast %cst_8 : f32 to vector<128x128xf32>
    %10 = arith.maximumf %8, %9 : vector<128x128xf32>
    %c0_9 = arith.constant 0 : index
    %c0_10 = arith.constant 0 : index
    %11 = vector.load %arg3[%c0_9, %c0_10] : memref<128x32xf32, #tpu.memory_space<vmem>>, vector<128x32xf32>
    %cst_11 = arith.constant dense<0.000000e+00> : vector<128x32xf32>
    %12 = tpu.matmul %10, %11, %cst_11 {dimension_numbers = #tpu.dot_dimension_numbers<[1], [0], [0], [1], [0, 0, 1, 1], [], []>} : vector<128x128xf32>, vector<128x32xf32>, vector<128x32xf32> -> vector<128x32xf32>
    %13 = vector.broadcast %2 : vector<1x32xf32> to vector<128x32xf32>
    %14 = arith.addf %12, %13 : vector<128x32xf32>
    %cst_12 = arith.constant 0.000000e+00 : f32
    %15 = vector.broadcast %cst_12 : f32 to vector<128x32xf32>
    %16 = arith.maximumf %14, %15 : vector<128x32xf32>
    %c0_13 = arith.constant 0 : index
    %c0_14 = arith.constant 0 : index
    %17 = vector.load %arg4[%c0_13, %c0_14] : memref<32x32xf32, #tpu.memory_space<vmem>>, vector<32x32xf32>
    %cst_15 = arith.constant dense<0.000000e+00> : vector<128x32xf32>
    %18 = tpu.matmul %16, %17, %cst_15 {dimension_numbers = #tpu.dot_dimension_numbers<[1], [0], [0], [1], [0, 0, 1, 1], [], []>} : vector<128x32xf32>, vector<32x32xf32>, vector<128x32xf32> -> vector<128x32xf32>
    %19 = vector.broadcast %3 : vector<1x32xf32> to vector<128x32xf32>
    %20 = arith.addf %18, %19 : vector<128x32xf32>
    %cst_16 = arith.constant 0.000000e+00 : f32
    %21 = vector.broadcast %cst_16 : f32 to vector<128x32xf32>
    %22 = arith.maximumf %20, %21 : vector<128x32xf32>
    %c0_17 = arith.constant 0 : index
    %c0_18 = arith.constant 0 : index
    %23 = vector.load %arg5[%c0_17, %c0_18] : memref<32x2xf32, #tpu.memory_space<vmem>>, vector<32x2xf32>
    %cst_19 = arith.constant dense<0.000000e+00> : vector<128x2xf32>
    %24 = tpu.matmul %22, %23, %cst_19 {dimension_numbers = #tpu.dot_dimension_numbers<[1], [0], [0], [1], [0, 0, 1, 1], [], []>} : vector<128x32xf32>, vector<32x2xf32>, vector<128x2xf32> -> vector<128x2xf32>
    %25 = vector.broadcast %4 : vector<1x2xf32> to vector<128x2xf32>
    %26 = arith.addf %24, %25 : vector<128x2xf32>
    %27 = tpu.iota {dimensions = array<i32: 1>} : vector<128x2xi32>
    %c1_i32 = arith.constant 1 : i32
    %28 = vector.broadcast %c1_i32 : i32 to vector<128x2xi32>
    %29 = arith.cmpi sge, %27, %28 : vector<128x2xi32>
    %cst_20 = arith.constant 0.000000e+00 : f32
    %30 = vector.broadcast %cst_20 : f32 to vector<128x2xf32>
    %31 = arith.maximumf %26, %30 : vector<128x2xf32>
    %32 = math.absf %26 : vector<128x2xf32>
    %cst_21 = arith.constant 0.000000e+00 : f32
    %33 = vector.broadcast %cst_21 : f32 to vector<128x2xf32>
    %34 = arith.subf %33, %32 : vector<128x2xf32>
    %35 = math.exp %34 : vector<128x2xf32>
    %36 = math.log1p %35 : vector<128x2xf32>
    %37 = arith.addf %31, %36 : vector<128x2xf32>
    %cst_22 = arith.constant 2.000000e+01 : f32
    %38 = vector.broadcast %cst_22 : f32 to vector<128x2xf32>
    %39 = arith.cmpf ogt, %26, %38 : vector<128x2xf32>
    %40 = arith.select %39, %26, %37 : vector<128x2xi1>, vector<128x2xf32>
    %41 = arith.select %29, %40, %26 : vector<128x2xi1>, vector<128x2xf32>
    %c0_23 = arith.constant 0 : index
    %c0_24 = arith.constant 0 : index
    %42 = vector.load %arg7[%c0_23, %c0_24] : memref<128x2xf32, #tpu.memory_space<vmem>>, vector<128x2xf32>
    tpu.vector_store %arg7[%c0_23, %c0_24], %41 {strides = array<i32>} : memref<128x2xf32, #tpu.memory_space<vmem>>, vector<128x2xf32>,
    return
  }
  func.func @transform_0(%arg0: i32) -> (i32, i32) {
    %c0_i32 = arith.constant 0 : i32
    %c0_i32_0 = arith.constant 0 : i32
    return %arg0, %c0_i32 : i32, i32
  }
  func.func @transform_1(%arg0: i32) -> (i32, i32) {
    %c0_i32 = arith.constant 0 : i32
    %c0_i32_0 = arith.constant 0 : i32
    %c0_i32_1 = arith.constant 0 : i32
    return %c0_i32, %c0_i32_0 : i32, i32
  }
  func.func @transform_2(%arg0: i32) -> (i32, i32) {
    %c0_i32 = arith.constant 0 : i32
    %c0_i32_0 = arith.constant 0 : i32
    %c0_i32_1 = arith.constant 0 : i32
    return %c0_i32, %c0_i32_0 : i32, i32
  }
  func.func @transform_3(%arg0: i32) -> (i32, i32) {
    %c0_i32 = arith.constant 0 : i32
    %c0_i32_0 = arith.constant 0 : i32
    %c0_i32_1 = arith.constant 0 : i32
    return %c0_i32, %c0_i32_0 : i32, i32
  }
  func.func @transform_4(%arg0: i32) -> (i32, i32) {
    %c0_i32 = arith.constant 0 : i32
    %c0_i32_0 = arith.constant 0 : i32
    %c0_i32_1 = arith.constant 0 : i32
    return %c0_i32, %c0_i32_0 : i32, i32
  }
  func.func @transform_5(%arg0: i32) -> (i32, i32) {
    %c0_i32 = arith.constant 0 : i32
    %c0_i32_0 = arith.constant 0 : i32
    %c0_i32_1 = arith.constant 0 : i32
    return %c0_i32, %c0_i32_0 : i32, i32
  }
  func.func @transform_6(%arg0: i32) -> (i32, i32) {
    %c0_i32 = arith.constant 0 : i32
    %c0_i32_0 = arith.constant 0 : i32
    return %arg0, %c0_i32 : i32, i32
  }
}

</mosaic_0001>

<bundles_post_ra>
// kernel: tpu_custom_call.1
= control target key start
LH: loop header
LB: loop body
LE: loop exit
PB: predicated region body
PF: predicated region fallthrough
CT: control target
= control target key end

     0   :  { %s1324_s21 = smov 0   ;;  %s1725_s0 = inlined_call_operand.vmem [shape: f32[256,12], index: 0, kind: input, shape index: {}]   ;;  %s1726_s1 = inlined_call_operand.vmem [shape: f32[12,128], index: 1, kind: input, shape index: {}]   ;;  %s1727_s2 = inlined_call_operand.vmem [shape: f32[128,32], index: 2, kind: input, shape index: {}]   ;;  %s1728_s3 = inlined_call_operand.vmem [shape: f32[32,32], index: 3, kind: input, shape index: {}]   ;;  %s1729_s4 = inlined_call_operand.vmem [shape: f32[32,2], index: 4, kind: input, shape index: {}]   ;;  %s1730_s5 = inlined_call_operand.vmem [shape: f32[8,128], index: 5, kind: input, shape index: {}]   ;;  %s1731_s6 = inlined_call_operand.vmem [shape: f32[256,2], index: 6, kind: output, shape index: {}]  }
   0x1 LB: > { %s1127_s22 = sadd.s32 4294967295, %s1287_s21   ;;  %p1131_p0 = scmp.ge.s32.totalorder %s1287_s21, 1  ;;  %s1287_s21 = sphi %s1324_s21, %s16_s21  }
   0x2   : > { %p213_p1 = scmp.lt.s32.totalorder %s1287_s21, 3 }
   0x4   : > { %p214_p2 = pnand %p1131_p0, %p213_p1 }
   0x5   : > { %s1132_s27 = sshll.u32 (!%p214_p2), %s1127_s22, 4 }
   0x6   : > { %217 = sbr.rel (%p214_p2) target bundleno = 695 (0x2b7), region = 44  ;;  %p244_p3 = scmp.lt.s32.totalorder (!%p214_p2), %s1132_s27, 31 }
   0xb   : > { %v276_v0 = vld [vmem:[%s1726_s1 + $0x8] sm:$0xf]  ;;  %vm327_vm0 = vcmask 1043456   ;;  %v275_v1 = vld [vmem:[%s1726_s1] sm:$0xff]  ;;  %v427_v2 = vld [vmem:[%s1727_s2 + $0x78] sm:$0xff]  ;;  %s1733_s27 = smov (!%p244_p3, %s1132_s27), 31 }
   0xc   : > { %1136 = vmatpush.msk.msra.mxu0 %vm327_vm0, %v276_v0  ;;  %1187 = vmatpush.msk.msra.mxu2 %vm327_vm0, %v276_v0  ;;  %v426_v3 = vld [vmem:[%s1727_s2 + $0x70] sm:$0xff]  ;;  %s1133_s8 = sshll.u32 %s1733_s27, 3  ;;  %vm278_vm1 = vcmask 97280   ;;  %v425_v4 = vld [vmem:[%s1727_s2 + $0x68] sm:$0xff]  ;;  %v424_v6 = vld [vmem:[%s1727_s2 + $0x60] sm:$0xff]  ;;  %vm515_vm2 = vcmask 261120  }
   0xd   : > { %1189 = vmatpush.msra.mxu1 %v427_v2  ;;  %s1355_s13 = scalar_lea.vmem %s1725_s0, %s1133_s8  ;;  %v423_v8 = vld [vmem:[%s1727_s2 + $0x58] sm:$0xff]  ;;  %v422_v10 = vld [vmem:[%s1727_s2 + $0x50] sm:$0xff]  ;;  %v421_v11 = vld [vmem:[%s1727_s2 + $0x48] sm:$0xff]  ;;  %s1555_s25 = scalar_lea.vmem %s1731_s6, %s1133_s8  ;;  %vm1054_vm6 = vcmask 15360  }
   0xe   : > { %346 = vmatpush.msra.mxu0 %v275_v1  ;;  %1188 = vmatpush.msra.mxu2 %v275_v1  ;;  %v255_v5 = vld [vmem:[%s1355_s13] sm:$0xff]  ;;  %v256_v7 = vld [vmem:[%s1355_s13 + $0x8] sm:$0xff]  ;;  %v257_v9 = vld [vmem:[%s1355_s13 + $0x10] sm:$0xff] }
   0xf   : > { %1190 = vmatpush.msra.mxu1 %v426_v3  ;;  %1137 = vmatmul.msk.f32.vlgmr.msra.gmra.mxu0 %vm278_vm1, %v255_v5  ;;  %v258_v12 = vld [vmem:[%s1355_s13 + $0x18] sm:$0xff]  ;;  %v420_v13 = vld [vmem:[%s1727_s2 + $0x40] sm:$0xff]  ;;  %v260_v16 = vld [vmem:[%s1355_s13 + $0x28] sm:$0xff] }
  0x10   : > { %429 = vmatpush.msrb.mxu0 %v427_v2  ;;  %v259_v14 = vld [vmem:[%s1355_s13 + $0x20] sm:$0xff]  ;;  %v419_v15 = vld [vmem:[%s1727_s2 + $0x38] sm:$0xff]  ;;  %v418_v17 = vld [vmem:[%s1727_s2 + $0x30] sm:$0xff] }
  0x11   : > { %1191 = vmatpush.msra.mxu1 %v425_v4  ;;  %v261_v18 = vld [vmem:[%s1355_s13 + $0x30] sm:$0xff]  ;;  %v417_v19 = vld [vmem:[%s1727_s2 + $0x28] sm:$0xff]  ;;  %v262_v20 = vld [vmem:[%s1355_s13 + $0x38] sm:$0xff] }
  0x12   : > { %430 = vmatpush.msrb.mxu0 %v426_v3  ;;  %v416_v21 = vld [vmem:[%s1727_s2 + $0x20] sm:$0xff]  ;;  %v415_v23 = vld [vmem:[%s1727_s2 + $0x18] sm:$0xff]  ;;  %v264_v24 = vld [vmem:[%s1355_s13 + $0x48] sm:$0xff] }
  0x13   : > { %1192 = vmatpush.msra.mxu1 %v424_v6  ;;  %v263_v22 = vld [vmem:[%s1355_s13 + $0x40] sm:$0xff]  ;;  %v414_v25 = vld [vmem:[%s1727_s2 + $0x10] sm:$0xff]  ;;  %v270_v27 = vld [vmem:[%s1355_s13 + $0x78] sm:$0xff] }
  0x14   : > { %431 = vmatpush.msrb.mxu0 %v425_v4  ;;  %v265_v26 = vld [vmem:[%s1355_s13 + $0x50] sm:$0xff]  ;;  %v413_v28 = vld [vmem:[%s1727_s2 + $0x8] sm:$0xff]  ;;  %v412_v29 = vld [vmem:[%s1727_s2] sm:$0xff]  ;;  %1152 = vmatmul.msk.f32.vlgmr.msra.gmra.mxu2 %vm278_vm1, %v270_v27 }
  0x15   : > { %1193 = vmatpush.msra.mxu1 %v423_v8  ;;  %v266_v30 = vld [vmem:[%s1355_s13 + $0x58] sm:$0xff]  ;;  %v267_v31 = vld [vmem:[%s1355_s13 + $0x60] sm:$0xff]  ;;  %v268_v32 = vld [vmem:[%s1355_s13 + $0x68] sm:$0xff] }
  0x16   : > { %432 = vmatpush.msrb.mxu0 %v424_v6  ;;  %v269_v33 = vld [vmem:[%s1355_s13 + $0x70] sm:$0xff]  ;;  %v1431_v34 = vld [vmem:[%s1730_s5] ss:$0 sm:$0xff] }
  0x17   : > { %1138 = vmatmul.msk.f32.gmra.mxu0 %vm278_vm1, %v256_v7  ;;  %1194 = vmatpush.msra.mxu1 %v422_v10  ;;  %v513_v7 = vld [vmem:[%s1728_s3 + $0x18] sm:$0xff] }
  0x18   : > { %433 = vmatpush.msrb.mxu0 %v423_v8  ;;  %v512_v8 = vld [vmem:[%s1728_s3 + $0x10] sm:$0xff]  ;;  %576 = vmatpush.msrb.mxu2 %v513_v7 }
  0x19   : > { %1195 = vmatpush.msra.mxu1 %v421_v11 }
  0x1a   : > { %434 = vmatpush.msrb.mxu0 %v422_v10  ;;  %577 = vmatpush.msrb.mxu2 %v512_v8 }
  0x1b   : > { %1196 = vmatpush.msra.mxu1 %v420_v13 }
  0x1c   : > { %435 = vmatpush.msrb.mxu0 %v421_v11 }
  0x1d   : > { %1197 = vmatpush.msra.mxu1 %v419_v15 }
  0x1e   : > { %436 = vmatpush.msrb.mxu0 %v420_v13  ;;  %v510_v13 = vld [vmem:[%s1728_s3] sm:$0xff] }
  0x1f   : > { %1139 = vmatmul.msk.f32.gmra.mxu0 %vm278_vm1, %v257_v9  ;;  %1198 = vmatpush.msra.mxu1 %v418_v17 }
  0x20   : > { %437 = vmatpush.msrb.mxu0 %v419_v15 }
  0x21   : > { %1199 = vmatpush.msra.mxu1 %v417_v19 }
  0x22   : > { %438 = vmatpush.msrb.mxu0 %v418_v17 }
  0x23   : > { %1200 = vmatpush.msra.mxu1 %v416_v21 }
  0x24   : > { %439 = vmatpush.msrb.mxu0 %v417_v19 }
  0x25   : > { %1201 = vmatpush.msra.mxu1 %v415_v23 }
  0x26   : > { %440 = vmatpush.msrb.mxu0 %v416_v21 }
  0x27   : > { %1140 = vmatmul.msk.f32.gmra.mxu0 %vm278_vm1, %v258_v12  ;;  %1202 = vmatpush.msra.mxu1 %v414_v25  ;;  %v511_v12 = vld [vmem:[%s1728_s3 + $0x8] sm:$0xff] }
  0x28   : > { %441 = vmatpush.msrb.mxu0 %v415_v23  ;;  %578 = vmatpush.msrb.mxu2 %v511_v12  ;;  %v1464_v23 = vld [vmem:[%s1730_s5 + $0x1] ss:$0 sm:$0xff]  ;;  %v1215_v12 = vld [vmem:[%s1730_s5 + $0x2] ss:$0 sm:$0xff] }
  0x29   : > { %1203 = vmatpush.msra.mxu1 %v413_v28 }
  0x2a   : > { %442 = vmatpush.msrb.mxu0 %v414_v25  ;;  %579 = vmatpush.msrb.mxu2 %v510_v13 }
  0x2b   : > { %1204 = vmatpush.msra.mxu1 %v412_v29 }
  0x2c   : > { %443 = vmatpush.msrb.mxu0 %v413_v28 }
  0x2e   : > { %444 = vmatpush.msrb.mxu0 %v412_v29 }
  0x2f   : > { %1141 = vmatmul.msk.f32.gmra.mxu0 %vm278_vm1, %v259_v14 }
  0x37   : > { %1142 = vmatmul.msk.f32.gmra.mxu0 %vm278_vm1, %v260_v16 }
  0x3f   : > { %1143 = vmatmul.msk.f32.gmra.mxu0 %vm278_vm1, %v261_v18 }
  0x47   : > { %1144 = vmatmul.msk.f32.gmra.mxu0 %vm278_vm1, %v262_v20 }
  0x4f   : > { %1145 = vmatmul.msk.f32.gmra.mxu0 %vm278_vm1, %v263_v22 }
  0x57   : > { %1146 = vmatmul.msk.f32.gmra.mxu0 %vm278_vm1, %v264_v24 }
  0x5f   : > { %1147 = vmatmul.msk.f32.gmra.mxu0 %vm278_vm1, %v265_v26 }
  0x67   : > { %1148 = vmatmul.msk.f32.gmra.mxu0 %vm278_vm1, %v266_v30 }
  0x6f   : > { %1149 = vmatmul.msk.f32.gmra.mxu0 %vm278_vm1, %v267_v31 }
  0x77   : > { %1150 = vmatmul.msk.f32.gmra.mxu0 %vm278_vm1, %v268_v32 }
  0x7f   : > { %1151 = vmatmul.msk.f32.gmra.mxu0 %vm278_vm1, %v269_v33 }
  0x8c   : > { %v348_v35 = vpop.f32.mrf.mxu0 }
  0x8d   : > { %v349_v36 = vadd.f32 %v1431_v34, %v348_v35 }
  0x8f   : > { %v396_v37 = vmax.f32 %v349_v36, 0.0 }
  0x91   : > { %445 = vmatmul.f32.vlgmr.msrb.gmra.mxu0 %v396_v37 }
  0x94   : > { %v351_v38 = vpop.f32.mrf.mxu0 }
  0x95   : > { %v352_v39 = vadd.f32 %v1431_v34, %v351_v38 }
  0x97   : > { %v397_v40 = vmax.f32 %v352_v39, 0.0  ;;  %v393_v19 = vpop.f32.mrf.mxu2 }
  0x98   : > { %v394_v21 = vadd.f32 %v1431_v34, %v393_v19 }
  0x99   : > { %448 = vmatmul.f32.gmra.mxu0 %v397_v40 }
  0x9a   : > { %v411_v22 = vmax.f32 %v394_v21, 0.0 }
  0x9c   : > { %v354_v41 = vpop.f32.mrf.mxu0 }
  0x9d   : > { %v355_v42 = vadd.f32 %v1431_v34, %v354_v41 }
  0x9f   : > { %v398_v43 = vmax.f32 %v355_v42, 0.0 }
  0xa1   : > { %451 = vmatmul.f32.vlgmr.msra.gmra.mxu1 %v398_v43 }
  0xa4   : > { %v357_v44 = vpop.f32.mrf.mxu0 }
  0xa5   : > { %v358_v45 = vadd.f32 %v1431_v34, %v357_v44 }
  0xa7   : > { %v399_v46 = vmax.f32 %v358_v45, 0.0 }
  0xa9   : > { %454 = vmatmul.f32.gmra.mxu1 %v399_v46 }
  0xac   : > { %v360_v47 = vpop.f32.mrf.mxu0 }
  0xad   : > { %v361_v48 = vadd.f32 %v1431_v34, %v360_v47 }
  0xaf   : > { %v400_v49 = vmax.f32 %v361_v48, 0.0 }
  0xb1   : > { %457 = vmatmul.f32.gmra.mxu1 %v400_v49 }
  0xb4   : > { %v363_v50 = vpop.f32.mrf.mxu0 }
  0xb5   : > { %v364_v51 = vadd.f32 %v1431_v34, %v363_v50 }
  0xb7   : > { %v401_v52 = vmax.f32 %v364_v51, 0.0 }
  0xb9   : > { %460 = vmatmul.f32.gmra.mxu1 %v401_v52 }
  0xbc   : > { %v366_v53 = vpop.f32.mrf.mxu0 }
  0xbd   : > { %v367_v54 = vadd.f32 %v1431_v34, %v366_v53 }
  0xbf   : > { %v402_v55 = vmax.f32 %v367_v54, 0.0 }
  0xc1   : > { %463 = vmatmul.f32.gmra.mxu1 %v402_v55 }
  0xc4   : > { %v369_v56 = vpop.f32.mrf.mxu0 }
  0xc5   : > { %v370_v57 = vadd.f32 %v1431_v34, %v369_v56 }
  0xc7   : > { %v403_v58 = vmax.f32 %v370_v57, 0.0 }
  0xc9   : > { %466 = vmatmul.f32.gmra.mxu1 %v403_v58 }
  0xcc   : > { %v372_v59 = vpop.f32.mrf.mxu0 }
  0xcd   : > { %v373_v60 = vadd.f32 %v1431_v34, %v372_v59 }
  0xcf   : > { %v404_v61 = vmax.f32 %v373_v60, 0.0  ;;  %v648_v60 = vld [vmem:[%s1729_s4 + $0x18] sm:$0xff] }
  0xd0   : > { %710 = vmatpush.msra.mxu3 %v648_v60 }
  0xd1   : > { %469 = vmatmul.f32.gmra.mxu1 %v404_v61 }
  0xd4   : > { %v375_v62 = vpop.f32.mrf.mxu0 }
  0xd5   : > { %v376_v63 = vadd.f32 %v1431_v34, %v375_v62 }
  0xd7   : > { %v405_v0 = vmax.f32 %v376_v63, 0.0 }
  0xd9   : > { %472 = vmatmul.f32.gmra.mxu1 %v405_v0  ;;  %v647_v0 = vld [vmem:[%s1729_s4 + $0x10] sm:$0xff] }
  0xda   : > { %711 = vmatpush.msra.mxu3 %v647_v0 }
  0xdc   : > { %v378_v1 = vpop.f32.mrf.mxu0 }
  0xdd   : > { %v379_v2 = vadd.f32 %v1431_v34, %v378_v1 }
  0xdf   : > { %v406_v3 = vmax.f32 %v379_v2, 0.0 }
  0xe1   : > { %475 = vmatmul.f32.gmra.mxu1 %v406_v3  ;;  %v646_v3 = vld [vmem:[%s1729_s4 + $0x8] sm:$0xff] }
  0xe2   : > { %712 = vmatpush.msra.mxu3 %v646_v3 }
  0xe4   : > { %v381_v4 = vpop.f32.mrf.mxu0 }
  0xe5   : > { %v382_v5 = vadd.f32 %v1431_v34, %v381_v4 }
  0xe7   : > { %v407_v6 = vmax.f32 %v382_v5, 0.0  ;;  %v645_v5 = vld [vmem:[%s1729_s4] sm:$0xff] }
  0xe8   : > { %713 = vmatpush.msra.mxu3 %v645_v5 }
  0xe9   : > { %478 = vmatmul.f32.gmra.mxu1 %v407_v6 }
  0xec   : > { %v384_v9 = vpop.f32.mrf.mxu0 }
  0xed   : > { %v385_v10 = vadd.f32 %v1431_v34, %v384_v9 }
  0xef   : > { %v408_v11 = vmax.f32 %v385_v10, 0.0 }
  0xf1   : > { %481 = vmatmul.f32.gmra.mxu1 %v408_v11 }
  0xf4   : > { %v387_v14 = vpop.f32.mrf.mxu0 }
  0xf5   : > { %v388_v15 = vadd.f32 %v1431_v34, %v387_v14 }
  0xf7   : > { %v409_v16 = vmax.f32 %v388_v15, 0.0 }
  0xf9   : > { %484 = vmatmul.f32.gmra.mxu1 %v409_v16 }
  0xfc   : > { %v390_v17 = vpop.f32.mrf.mxu0 }
  0xfd   : > { %v391_v18 = vadd.f32 %v1431_v34, %v390_v17 }
  0xff   : > { %v410_v20 = vmax.f32 %v391_v18, 0.0 }
 0x101   : > { %487 = vmatmul.f32.gmra.mxu1 %v410_v20 }
 0x109   : > { %490 = vmatmul.f32.gmra.mxu1 %v411_v22 }
 0x10e   : > { %v446_v24 = vpop.f32.mrf.mxu0 }
 0x10f   : > { %v447_v25 = vadd.f32 %v1464_v23, %v446_v24 }
 0x111   : > { %v494_v26 = vmax.f32 %v447_v25, 0.0 }
 0x113   : > { %1153 = vmatmul.msk.f32.vlgmr.msrb.gmra.mxu2 %vm515_vm2, %v494_v26 }
 0x116   : > { %v449_v27 = vpop.f32.mrf.mxu0 }
 0x117   : > { %v450_v28 = vadd.f32 %v1464_v23, %v449_v27 }
 0x119   : > { %v495_v29 = vmax.f32 %v450_v28, 0.0 }
 0x11b   : > { %1154 = vmatmul.msk.f32.gmra.mxu2 %vm515_vm2, %v495_v29 }
 0x11e   : > { %v452_v30 = vpop.f32.mrf.mxu1 }
 0x11f   : > { %v453_v31 = vadd.f32 %v1464_v23, %v452_v30 }
 0x121   : > { %v496_v32 = vmax.f32 %v453_v31, 0.0 }
 0x123   : > { %1155 = vmatmul.msk.f32.gmra.mxu2 %vm515_vm2, %v496_v32 }
 0x126   : > { %v455_v33 = vpop.f32.mrf.mxu1 }
 0x127   : > { %v456_v34 = vadd.f32 %v1464_v23, %v455_v33 }
 0x129   : > { %v497_v35 = vmax.f32 %v456_v34, 0.0 }
 0x12b   : > { %1156 = vmatmul.msk.f32.gmra.mxu2 %vm515_vm2, %v497_v35 }
 0x12e   : > { %v458_v36 = vpop.f32.mrf.mxu1 }
 0x12f   : > { %v459_v37 = vadd.f32 %v1464_v23, %v458_v36 }
 0x131   : > { %v498_v38 = vmax.f32 %v459_v37, 0.0 }
 0x133   : > { %1157 = vmatmul.msk.f32.gmra.mxu2 %vm515_vm2, %v498_v38 }
 0x136   : > { %v461_v39 = vpop.f32.mrf.mxu1 }
 0x137   : > { %v462_v40 = vadd.f32 %v1464_v23, %v461_v39 }
 0x139   : > { %v499_v41 = vmax.f32 %v462_v40, 0.0 }
 0x13b   : > { %1158 = vmatmul.msk.f32.gmra.mxu2 %vm515_vm2, %v499_v41 }
 0x13e   : > { %v464_v42 = vpop.f32.mrf.mxu1 }
 0x13f   : > { %v465_v43 = vadd.f32 %v1464_v23, %v464_v42 }
 0x141   : > { %v500_v44 = vmax.f32 %v465_v43, 0.0 }
 0x143   : > { %1159 = vmatmul.msk.f32.gmra.mxu2 %vm515_vm2, %v500_v44 }
 0x146   : > { %v467_v45 = vpop.f32.mrf.mxu1 }
 0x147   : > { %v468_v46 = vadd.f32 %v1464_v23, %v467_v45 }
 0x149   : > { %v501_v47 = vmax.f32 %v468_v46, 0.0 }
 0x14b   : > { %1160 = vmatmul.msk.f32.gmra.mxu2 %vm515_vm2, %v501_v47 }
 0x14e   : > { %v470_v48 = vpop.f32.mrf.mxu1 }
 0x14f   : > { %v471_v49 = vadd.f32 %v1464_v23, %v470_v48 }
 0x151   : > { %v502_v50 = vmax.f32 %v471_v49, 0.0 }
 0x153   : > { %1161 = vmatmul.msk.f32.gmra.mxu2 %vm515_vm2, %v502_v50 }
 0x156   : > { %v473_v51 = vpop.f32.mrf.mxu1 }
 0x157   : > { %v474_v52 = vadd.f32 %v1464_v23, %v473_v51 }
 0x159   : > { %v503_v53 = vmax.f32 %v474_v52, 0.0 }
 0x15b   : > { %1162 = vmatmul.msk.f32.gmra.mxu2 %vm515_vm2, %v503_v53 }
 0x15e   : > { %v476_v54 = vpop.f32.mrf.mxu1 }
 0x15f   : > { %v477_v55 = vadd.f32 %v1464_v23, %v476_v54 }
 0x161   : > { %v504_v56 = vmax.f32 %v477_v55, 0.0 }
 0x163   : > { %1163 = vmatmul.msk.f32.gmra.mxu2 %vm515_vm2, %v504_v56 }
 0x166   : > { %v479_v57 = vpop.f32.mrf.mxu1 }
 0x167   : > { %v480_v58 = vadd.f32 %v1464_v23, %v479_v57 }
 0x169   : > { %v505_v59 = vmax.f32 %v480_v58, 0.0 }
 0x16b   : > { %1164 = vmatmul.msk.f32.gmra.mxu2 %vm515_vm2, %v505_v59 }
 0x16e   : > { %v482_v61 = vpop.f32.mrf.mxu1 }
 0x16f   : > { %v483_v62 = vadd.f32 %v1464_v23, %v482_v61  ;;  %v1532_v61 = vld [vmem:[%s1730_s5 + $0x3] ss:$0 sm:$0xff] }
 0x171   : > { %v506_v63 = vmax.f32 %v483_v62, 0.0 }
 0x173   : > { %1165 = vmatmul.msk.f32.gmra.mxu2 %vm515_vm2, %v506_v63 }
 0x176   : > { %v485_v1 = vpop.f32.mrf.mxu1 }
 0x177   : > { %v486_v2 = vadd.f32 %v1464_v23, %v485_v1 }
 0x179   : > { %v507_v4 = vmax.f32 %v486_v2, 0.0 }
 0x17b   : > { %1166 = vmatmul.msk.f32.gmra.mxu2 %vm515_vm2, %v507_v4 }
 0x17e   : > { %v488_v6 = vpop.f32.mrf.mxu1 }
 0x17f   : > { %v489_v7 = vadd.f32 %v1464_v23, %v488_v6 }
 0x181   : > { %v508_v8 = vmax.f32 %v489_v7, 0.0 }
 0x183   : > { %1167 = vmatmul.msk.f32.gmra.mxu2 %vm515_vm2, %v508_v8 }
 0x186   : > { %v491_v9 = vpop.f32.mrf.mxu1 }
 0x187   : > { %v492_v10 = vadd.f32 %v1464_v23, %v491_v9 }
 0x189   : > { %v509_v11 = vmax.f32 %v492_v10, 0.0 }
 0x18b   : > { %1168 = vmatmul.msk.f32.gmra.mxu2 %vm515_vm2, %v509_v11 }
 0x196   : > { %v581_v13 = vpop.f32.mrf.mxu2 }
 0x197   : > { %v582_v14 = vadd.f32 %v1215_v12, %v581_v13 }
 0x199   : > { %v629_v15 = vmax.f32 %v582_v14, 0.0  ;;  %v763_v14 = vlaneseq }
 0x19b   : > { %1169 = vmatmul.msk.f32.vlgmr.msra.gmra.mxu3 %vm515_vm2, %v629_v15 }
 0x19e   : > { %v584_v16 = vpop.f32.mrf.mxu2 }
 0x19f   : > { %v585_v17 = vadd.f32 %v1215_v12, %v584_v16 }
 0x1a1   : > { %v630_v18 = vmax.f32 %v585_v17, 0.0 }
 0x1a3   : > { %1170 = vmatmul.msk.f32.gmra.mxu3 %vm515_vm2, %v630_v18 }
 0x1a6   : > { %v587_v19 = vpop.f32.mrf.mxu2 }
 0x1a7   : > { %v588_v20 = vadd.f32 %v1215_v12, %v587_v19 }
 0x1a9   : > { %v631_v21 = vmax.f32 %v588_v20, 0.0 }
 0x1ab   : > { %1171 = vmatmul.msk.f32.gmra.mxu3 %vm515_vm2, %v631_v21  ;;  %v1543_v21 = vand.u32 127, %v763_v14 }
 0x1ad   : > { %vm765_vm4 = vcmp.ge.s32.totalorder %v1543_v21, 1 }
 0x1ae   : > { %v590_v22 = vpop.f32.mrf.mxu2 }
 0x1af   : > { %v591_v23 = vadd.f32 %v1215_v12, %v590_v22 }
 0x1b1   : > { %v632_v24 = vmax.f32 %v591_v23, 0.0 }
 0x1b3   : > { %1172 = vmatmul.msk.f32.gmra.mxu3 %vm515_vm2, %v632_v24 }
 0x1b6   : > { %v593_v25 = vpop.f32.mrf.mxu2 }
 0x1b7   : > { %v594_v26 = vadd.f32 %v1215_v12, %v593_v25 }
 0x1b9   : > { %v633_v27 = vmax.f32 %v594_v26, 0.0 }
 0x1bb   : > { %1173 = vmatmul.msk.f32.gmra.mxu3 %vm515_vm2, %v633_v27 }
 0x1be   : > { %v596_v28 = vpop.f32.mrf.mxu2 }
 0x1bf   : > { %v597_v29 = vadd.f32 %v1215_v12, %v596_v28 }
 0x1c1   : > { %v634_v30 = vmax.f32 %v597_v29, 0.0 }
 0x1c3   : > { %1174 = vmatmul.msk.f32.gmra.mxu3 %vm515_vm2, %v634_v30 }
 0x1c6   : > { %v599_v31 = vpop.f32.mrf.mxu2 }
 0x1c7   : > { %v600_v32 = vadd.f32 %v1215_v12, %v599_v31 }
 0x1c9   : > { %v635_v33 = vmax.f32 %v600_v32, 0.0 }
 0x1cb   : > { %1175 = vmatmul.msk.f32.gmra.mxu3 %vm515_vm2, %v635_v33 }
 0x1ce   : > { %v602_v34 = vpop.f32.mrf.mxu2 }
 0x1cf   : > { %v603_v35 = vadd.f32 %v1215_v12, %v602_v34 }
 0x1d1   : > { %v636_v36 = vmax.f32 %v603_v35, 0.0 }
 0x1d3   : > { %1176 = vmatmul.msk.f32.gmra.mxu3 %vm515_vm2, %v636_v36 }
 0x1d6   : > { %v605_v37 = vpop.f32.mrf.mxu2 }
 0x1d7   : > { %v606_v38 = vadd.f32 %v1215_v12, %v605_v37 }
 0x1d9   : > { %v637_v39 = vmax.f32 %v606_v38, 0.0 }
 0x1db   : > { %1177 = vmatmul.msk.f32.gmra.mxu3 %vm515_vm2, %v637_v39 }
 0x1de   : > { %v608_v40 = vpop.f32.mrf.mxu2 }
 0x1df   : > { %v609_v41 = vadd.f32 %v1215_v12, %v608_v40 }
 0x1e1   : > { %v638_v42 = vmax.f32 %v609_v41, 0.0 }
 0x1e3   : > { %1178 = vmatmul.msk.f32.gmra.mxu3 %vm515_vm2, %v638_v42 }
 0x1e6   : > { %v611_v43 = vpop.f32.mrf.mxu2 }
 0x1e7   : > { %v612_v44 = vadd.f32 %v1215_v12, %v611_v43 }
 0x1e9   : > { %v639_v45 = vmax.f32 %v612_v44, 0.0 }
 0x1eb   : > { %1179 = vmatmul.msk.f32.gmra.mxu3 %vm515_vm2, %v639_v45 }
 0x1ee   : > { %v614_v46 = vpop.f32.mrf.mxu2 }
 0x1ef   : > { %v615_v47 = vadd.f32 %v1215_v12, %v614_v46 }
 0x1f1   : > { %v640_v48 = vmax.f32 %v615_v47, 0.0 }
 0x1f3   : > { %1180 = vmatmul.msk.f32.gmra.mxu3 %vm515_vm2, %v640_v48 }
 0x1f6   : > { %v617_v49 = vpop.f32.mrf.mxu2 }
 0x1f7   : > { %v618_v50 = vadd.f32 %v1215_v12, %v617_v49 }
 0x1f9   : > { %v641_v51 = vmax.f32 %v618_v50, 0.0 }
 0x1fb   : > { %1181 = vmatmul.msk.f32.gmra.mxu3 %vm515_vm2, %v641_v51 }
 0x1fe   : > { %v620_v52 = vpop.f32.mrf.mxu2 }
 0x1ff   : > { %v621_v53 = vadd.f32 %v1215_v12, %v620_v52 }
 0x201   : > { %v642_v54 = vmax.f32 %v621_v53, 0.0 }
 0x203   : > { %1182 = vmatmul.msk.f32.gmra.mxu3 %vm515_vm2, %v642_v54 }
 0x206   : > { %v623_v55 = vpop.f32.mrf.mxu2 }
 0x207   : > { %v624_v56 = vadd.f32 %v1215_v12, %v623_v55 }
 0x209   : > { %v643_v57 = vmax.f32 %v624_v56, 0.0 }
 0x20b   : > { %1183 = vmatmul.msk.f32.gmra.mxu3 %vm515_vm2, %v643_v57 }
 0x20e   : > { %v626_v58 = vpop.f32.mrf.mxu2 }
 0x20f   : > { %v627_v59 = vadd.f32 %v1215_v12, %v626_v58 }
 0x211   : > { %v644_v60 = vmax.f32 %v627_v59, 0.0 }
 0x213   : > { %1184 = vmatmul.msk.f32.gmra.mxu3 %vm515_vm2, %v644_v60 }
 0x21e   : > { %v715_v62 = vpop.f32.mrf.mxu3 }
 0x21f   : > { %v716_v63 = vadd.f32 %v1532_v61, %v715_v62 }
 0x221   : > { %v782_v0 = vand.u32 2147483647, %v716_v63  ;;  %v766_v28 = vmax.f32 %v716_v63, 0.0  ;;  %vm1006_vm5 = vcmp.gt.f32.partialorder %v716_v63, 20.0 }
 0x223   : > { %v798_v1 = vsub.f32 0.0, %v782_v0 }
 0x225   : > { %v814_v2 = vmul.f32 1.442695, %v798_v1 }
 0x226   : > { %v718_v3 = vpop.f32.mrf.mxu3 }
 0x227   : > { %1217 = vpow2.f32 %v814_v2  ;;  %v1536_v4 = vadd.f32 %v1532_v61, %v718_v3 }
 0x229   : > { %v783_v5 = vand.u32 2147483647, %v1536_v4  ;;  %v767_v46 = vmax.f32 %v1536_v4, 0.0  ;;  %vm1007_vm8 = vcmp.gt.f32.partialorder %v1536_v4, 20.0 }
 0x22b   : > { %v799_v6 = vsub.f32 0.0, %v783_v5 }
 0x22d   : > { %v1218_v7 = vpop.eup %1217  ;;  %v816_v8 = vmul.f32 1.442695, %v799_v6 }
 0x22e   : > { %v846_v9 = vadd.f32 1.0, %v1218_v7  ;;  %v849_v10 = vmul.f32 -0.5, %v1218_v7  ;;  %v721_v11 = vpop.f32.mrf.mxu3  ;;  %v852_v17 = vand.u32 2147483647, %v1218_v7 }
 0x22f   : > { %1219 = vpow2.f32 %v816_v8  ;;  %v1540_v12 = vadd.f32 %v1532_v61, %v721_v11 }
 0x230   : > { %1221 = vlog2.f32 %v846_v9  ;;  %v850_v15 = vadd.f32 1.0, %v849_v10  ;;  %vm853_vm3 = vcmp.lt.f32.partialorder %v852_v17, 0.0004427343 }
 0x231   : > { %v784_v13 = vand.u32 2147483647, %v1540_v12  ;;  %v768_v1 = vmax.f32 %v1540_v12, 0.0  ;;  %vm1008_vm10 = vcmp.gt.f32.partialorder %v1540_v12, 20.0 }
 0x232   : > { %v851_v22 = vmul.f32 %v1218_v7, %v850_v15 }
 0x233   : > { %v800_v16 = vsub.f32 0.0, %v784_v13 }
 0x235   : > { %v1220_v18 = vpop.eup %1219  ;;  %v818_v19 = vmul.f32 1.442695, %v800_v16 }
 0x236   : > { %v1222_v20 = vpop.eup %1221  ;;  %v855_v23 = vadd.f32 1.0, %v1220_v18  ;;  %v724_v24 = vpop.f32.mrf.mxu3  ;;  %v858_v26 = vmul.f32 -0.5, %v1220_v18  ;;  %v861_v35 = vand.u32 2147483647, %v1220_v18 }
 0x237   : > { %v848_v25 = vmul.f32 0.6931472, %v1222_v20  ;;  %1223 = vpow2.f32 %v818_v19  ;;  %v1546_v27 = vadd.f32 %v1532_v61, %v724_v24 }
 0x238   : > { %1225 = vlog2.f32 %v855_v23  ;;  %v859_v32 = vadd.f32 1.0, %v858_v26  ;;  %vm862_vm7 = vcmp.lt.f32.partialorder %v861_v35, 0.0004427343 }
 0x239   : > { %v854_v29 = vsel %vm853_vm3, %v851_v22, %v848_v25  ;;  %v785_v30 = vand.u32 2147483647, %v1546_v27  ;;  %v769_v20 = vmax.f32 %v1546_v27, 0.0  ;;  %vm1009_vm12 = vcmp.gt.f32.partialorder %v1546_v27, 20.0 }
 0x23a   : > { %v990_v31 = vadd.f32 %v854_v29, %v766_v28  ;;  %v860_v44 = vmul.f32 %v1220_v18, %v859_v32 }
 0x23b   : > { %v801_v33 = vsub.f32 0.0, %v785_v30 }
 0x23c   : > { %v1022_v34 = vsel %vm1006_vm5, %v716_v63, %v990_v31 }
 0x23d   : > { %v1224_v36 = vpop.eup %1223  ;;  %v1038_v37 = vsel %vm765_vm4, %v1022_v34, %v716_v63  ;;  %v820_v38 = vmul.f32 1.442695, %v801_v33 }
 0x23e   : > { %v1226_v39 = vpop.eup %1225  ;;  %1055 = vst.msk [vmem:[%s1555_s25] sm:$0xff] %vm1054_vm6, %v1038_v37  ;;  %v864_v40 = vadd.f32 1.0, %v1224_v36  ;;  %v867_v41 = vmul.f32 -0.5, %v1224_v36  ;;  %v727_v42 = vpop.f32.mrf.mxu3  ;;  %v870_v53 = vand.u32 2147483647, %v1224_v36 }
 0x23f   : > { %v857_v43 = vmul.f32 0.6931472, %v1226_v39  ;;  %1227 = vpow2.f32 %v820_v38  ;;  %v1562_v45 = vadd.f32 %v1532_v61, %v727_v42 }
 0x240   : > { %1229 = vlog2.f32 %v864_v40  ;;  %v868_v50 = vadd.f32 1.0, %v867_v41  ;;  %vm871_vm9 = vcmp.lt.f32.partialorder %v870_v53, 0.0004427343 }
 0x241   : > { %v863_v47 = vsel %vm862_vm7, %v860_v44, %v857_v43  ;;  %v786_v48 = vand.u32 2147483647, %v1562_v45  ;;  %v770_v39 = vmax.f32 %v1562_v45, 0.0  ;;  %vm1010_vm14 = vcmp.gt.f32.partialorder %v1562_v45, 20.0 }
 0x242   : > { %v991_v49 = vadd.f32 %v863_v47, %v767_v46  ;;  %v869_v58 = vmul.f32 %v1224_v36, %v868_v50 }
 0x243   : > { %v802_v51 = vsub.f32 0.0, %v786_v48 }
 0x244   : > { %v1023_v52 = vsel %vm1007_vm8, %v1536_v4, %v991_v49 }
 0x245   : > { %v1228_v54 = vpop.eup %1227  ;;  %v1039_v55 = vsel %vm765_vm4, %v1023_v52, %v1536_v4  ;;  %v822_v56 = vmul.f32 1.442695, %v802_v51 }
 0x246   : > { %v1230_v57 = vpop.eup %1229  ;;  %1056 = vst.msk [vmem:[%s1555_s25 + $0x8] sm:$0xff] %vm1054_vm6, %v1039_v55  ;;  %v873_v59 = vadd.f32 1.0, %v1228_v54  ;;  %v730_v60 = vpop.f32.mrf.mxu3  ;;  %v876_v63 = vmul.f32 -0.5, %v1228_v54  ;;  %v879_v8 = vand.u32 2147483647, %v1228_v54 }
 0x247   : > { %v866_v62 = vmul.f32 0.6931472, %v1230_v57  ;;  %1231 = vpow2.f32 %v822_v56  ;;  %v1574_v0 = vadd.f32 %v1532_v61, %v730_v60 }
 0x248   : > { %1233 = vlog2.f32 %v873_v59  ;;  %v877_v5 = vadd.f32 1.0, %v876_v63  ;;  %vm880_vm11 = vcmp.lt.f32.partialorder %v879_v8, 0.0004427343 }
 0x249   : > { %v872_v2 = vsel %vm871_vm9, %v869_v58, %v866_v62  ;;  %v787_v3 = vand.u32 2147483647, %v1574_v0  ;;  %v771_v57 = vmax.f32 %v1574_v0, 0.0  ;;  %vm1011_vm0 = vcmp.gt.f32.partialorder %v1574_v0, 20.0 }
 0x24a   : > { %v992_v4 = vadd.f32 %v872_v2, %v768_v1  ;;  %v878_v18 = vmul.f32 %v1228_v54, %v877_v5 }
 0x24b   : > { %v803_v6 = vsub.f32 0.0, %v787_v3 }
 0x24c   : > { %v1024_v7 = vsel %vm1008_vm10, %v1540_v12, %v992_v4 }
 0x24d   : > { %v1232_v9 = vpop.eup %1231  ;;  %v1040_v10 = vsel %vm765_vm4, %v1024_v7, %v1540_v12  ;;  %v824_v11 = vmul.f32 1.442695, %v803_v6 }
 0x24e   : > { %v1234_v13 = vpop.eup %1233  ;;  %1057 = vst.msk [vmem:[%s1555_s25 + $0x10] sm:$0xff] %vm1054_vm6, %v1040_v10  ;;  %v882_v14 = vadd.f32 1.0, %v1232_v9  ;;  %v885_v15 = vmul.f32 -0.5, %v1232_v9  ;;  %v733_v16 = vpop.f32.mrf.mxu3  ;;  %v888_v28 = vand.u32 2147483647, %v1232_v9 }
 0x24f   : > { %v875_v17 = vmul.f32 0.6931472, %v1234_v13  ;;  %1235 = vpow2.f32 %v824_v11  ;;  %v1586_v19 = vadd.f32 %v1532_v61, %v733_v16 }
 0x250   : > { %1237 = vlog2.f32 %v882_v14  ;;  %v886_v24 = vadd.f32 1.0, %v885_v15  ;;  %vm889_vm13 = vcmp.lt.f32.partialorder %v888_v28, 0.0004427343 }
 0x251   : > { %v881_v22 = vsel %vm880_vm11, %v878_v18, %v875_v17  ;;  %v788_v12 = vand.u32 2147483647, %v1586_v19  ;;  %v772_v13 = vmax.f32 %v1586_v19, 0.0  ;;  %vm1012_vm2 = vcmp.gt.f32.partialorder %v1586_v19, 20.0 }
 0x252   : > { %v993_v23 = vadd.f32 %v881_v22, %v769_v20  ;;  %v887_v33 = vmul.f32 %v1232_v9, %v886_v24 }
 0x253   : > { %v804_v25 = vsub.f32 0.0, %v788_v12 }
 0x254   : > { %v1025_v26 = vsel %vm1009_vm12, %v1546_v27, %v993_v23 }
 0x255   : > { %v1236_v29 = vpop.eup %1235  ;;  %v1041_v30 = vsel %vm765_vm4, %v1025_v26, %v1546_v27  ;;  %v826_v31 = vmul.f32 1.442695, %v804_v25 }
 0x256   : > { %v1238_v32 = vpop.eup %1237  ;;  %1058 = vst.msk [vmem:[%s1555_s25 + $0x18] sm:$0xff] %vm1054_vm6, %v1041_v30  ;;  %v891_v34 = vadd.f32 1.0, %v1236_v29  ;;  %v736_v35 = vpop.f32.mrf.mxu3  ;;  %v894_v37 = vmul.f32 -0.5, %v1236_v29  ;;  %v897_v46 = vand.u32 2147483647, %v1236_v29 }
 0x257   : > { %v884_v36 = vmul.f32 0.6931472, %v1238_v32  ;;  %1239 = vpow2.f32 %v826_v31  ;;  %v1598_v38 = vadd.f32 %v1532_v61, %v736_v35 }
 0x258   : > { %1241 = vlog2.f32 %v891_v34  ;;  %v895_v42 = vadd.f32 1.0, %v894_v37  ;;  %vm898_vm15 = vcmp.lt.f32.partialorder %v897_v46, 0.0004427343 }
 0x259   : > { %v890_v40 = vsel %vm889_vm13, %v887_v33, %v884_v36  ;;  %v789_v27 = vand.u32 2147483647, %v1598_v38  ;;  %v773_v32 = vmax.f32 %v1598_v38, 0.0  ;;  %vm1013_vm5 = vcmp.gt.f32.partialorder %v1598_v38, 20.0 }
 0x25a   : > { %v994_v41 = vadd.f32 %v890_v40, %v770_v39  ;;  %v896_v55 = vmul.f32 %v1236_v29, %v895_v42 }
 0x25b   : > { %v805_v43 = vsub.f32 0.0, %v789_v27 }
 0x25c   : > { %v1026_v44 = vsel %vm1010_vm14, %v1562_v45, %v994_v41 }
 0x25d   : > { %v1240_v47 = vpop.eup %1239  ;;  %v1042_v48 = vsel %vm765_vm4, %v1026_v44, %v1562_v45  ;;  %v828_v49 = vmul.f32 1.442695, %v805_v43 }
 0x25e   : > { %v1242_v50 = vpop.eup %1241  ;;  %1059 = vst.msk [vmem:[%s1555_s25 + $0x20] sm:$0xff] %vm1054_vm6, %v1042_v48  ;;  %v900_v51 = vadd.f32 1.0, %v1240_v47  ;;  %v903_v52 = vmul.f32 -0.5, %v1240_v47  ;;  %v739_v53 = vpop.f32.mrf.mxu3  ;;  %v906_v1 = vand.u32 2147483647, %v1240_v47 }
 0x25f   : > { %v893_v54 = vmul.f32 0.6931472, %v1242_v50  ;;  %1243 = vpow2.f32 %v828_v49  ;;  %v1610_v56 = vadd.f32 %v1532_v61, %v739_v53 }
 0x260   : > { %1245 = vlog2.f32 %v900_v51  ;;  %v904_v60 = vadd.f32 1.0, %v903_v52  ;;  %vm907_vm1 = vcmp.lt.f32.partialorder %v906_v1, 0.0004427343 }
 0x261   : > { %v899_v58 = vsel %vm898_vm15, %v896_v55, %v893_v54  ;;  %v790_v45 = vand.u32 2147483647, %v1610_v56  ;;  %v774_v50 = vmax.f32 %v1610_v56, 0.0  ;;  %vm1014_vm8 = vcmp.gt.f32.partialorder %v1610_v56, 20.0 }
 0x262   : > { %v995_v59 = vadd.f32 %v899_v58, %v771_v57  ;;  %v905_v6 = vmul.f32 %v1240_v47, %v904_v60 }
 0x263   : > { %v806_v62 = vsub.f32 0.0, %v790_v45 }
 0x264   : > { %v1027_v63 = vsel %vm1011_vm0, %v1574_v0, %v995_v59 }
 0x265   : > { %v1244_v2 = vpop.eup %1243  ;;  %v1043_v3 = vsel %vm765_vm4, %v1027_v63, %v1574_v0  ;;  %v830_v4 = vmul.f32 1.442695, %v806_v62 }
 0x266   : > { %v1246_v5 = vpop.eup %1245  ;;  %1060 = vst.msk [vmem:[%s1555_s25 + $0x28] sm:$0xff] %vm1054_vm6, %v1043_v3  ;;  %v909_v7 = vadd.f32 1.0, %v1244_v2  ;;  %v742_v8 = vpop.f32.mrf.mxu3  ;;  %v912_v10 = vmul.f32 -0.5, %v1244_v2  ;;  %v915_v20 = vand.u32 2147483647, %v1244_v2 }
 0x267   : > { %v902_v9 = vmul.f32 0.6931472, %v1246_v5  ;;  %1247 = vpow2.f32 %v830_v4  ;;  %v1622_v11 = vadd.f32 %v1532_v61, %v742_v8 }
 0x268   : > { %1249 = vlog2.f32 %v909_v7  ;;  %v913_v16 = vadd.f32 1.0, %v912_v10  ;;  %vm916_vm3 = vcmp.lt.f32.partialorder %v915_v20, 0.0004427343 }
 0x269   : > { %v908_v14 = vsel %vm907_vm1, %v905_v6, %v902_v9  ;;  %v791_v0 = vand.u32 2147483647, %v1622_v11  ;;  %v775_v5 = vmax.f32 %v1622_v11, 0.0  ;;  %vm1015_vm10 = vcmp.gt.f32.partialorder %v1622_v11, 20.0 }
 0x26a   : > { %v996_v15 = vadd.f32 %v908_v14, %v772_v13  ;;  %v914_v30 = vmul.f32 %v1244_v2, %v913_v16 }
 0x26b   : > { %v807_v17 = vsub.f32 0.0, %v791_v0 }
 0x26c   : > { %v1028_v18 = vsel %vm1012_vm2, %v1586_v19, %v996_v15 }
 0x26d   : > { %v1248_v22 = vpop.eup %1247  ;;  %v1044_v12 = vsel %vm765_vm4, %v1028_v18, %v1586_v19  ;;  %v832_v23 = vmul.f32 1.442695, %v807_v17 }
 0x26e   : > { %v1250_v24 = vpop.eup %1249  ;;  %1061 = vst.msk [vmem:[%s1555_s25 + $0x30] sm:$0xff] %vm1054_vm6, %v1044_v12  ;;  %v918_v25 = vadd.f32 1.0, %v1248_v22  ;;  %v921_v26 = vmul.f32 -0.5, %v1248_v22  ;;  %v745_v28 = vpop.f32.mrf.mxu3  ;;  %v924_v39 = vand.u32 2147483647, %v1248_v22 }
 0x26f   : > { %v911_v29 = vmul.f32 0.6931472, %v1250_v24  ;;  %1251 = vpow2.f32 %v832_v23  ;;  %v1634_v31 = vadd.f32 %v1532_v61, %v745_v28 }
 0x270   : > { %1253 = vlog2.f32 %v918_v25  ;;  %v922_v35 = vadd.f32 1.0, %v921_v26  ;;  %vm925_vm7 = vcmp.lt.f32.partialorder %v924_v39, 0.0004427343 }
 0x271   : > { %v917_v33 = vsel %vm916_vm3, %v914_v30, %v911_v29  ;;  %v792_v19 = vand.u32 2147483647, %v1634_v31  ;;  %v776_v24 = vmax.f32 %v1634_v31, 0.0  ;;  %vm1016_vm12 = vcmp.gt.f32.partialorder %v1634_v31, 20.0 }
 0x272   : > { %v997_v34 = vadd.f32 %v917_v33, %v773_v32  ;;  %v923_v43 = vmul.f32 %v1248_v22, %v922_v35 }
 0x273   : > { %v808_v36 = vsub.f32 0.0, %v792_v19 }
 0x274   : > { %v1029_v37 = vsel %vm1013_vm5, %v1598_v38, %v997_v34 }
 0x275   : > { %v1252_v40 = vpop.eup %1251  ;;  %v1045_v27 = vsel %vm765_vm4, %v1029_v37, %v1598_v38  ;;  %v834_v41 = vmul.f32 1.442695, %v808_v36 }
 0x276   : > { %v1254_v42 = vpop.eup %1253  ;;  %1062 = vst.msk [vmem:[%s1555_s25 + $0x38] sm:$0xff] %vm1054_vm6, %v1045_v27  ;;  %v927_v44 = vadd.f32 1.0, %v1252_v40  ;;  %v748_v46 = vpop.f32.mrf.mxu3  ;;  %v930_v48 = vmul.f32 -0.5, %v1252_v40  ;;  %v933_v57 = vand.u32 2147483647, %v1252_v40 }
 0x277   : > { %v920_v47 = vmul.f32 0.6931472, %v1254_v42  ;;  %1255 = vpow2.f32 %v834_v41  ;;  %v1646_v49 = vadd.f32 %v1532_v61, %v748_v46 }
 0x278   : > { %1257 = vlog2.f32 %v927_v44  ;;  %v931_v53 = vadd.f32 1.0, %v930_v48  ;;  %vm934_vm9 = vcmp.lt.f32.partialorder %v933_v57, 0.0004427343 }
 0x279   : > { %v926_v51 = vsel %vm925_vm7, %v923_v43, %v920_v47  ;;  %v793_v38 = vand.u32 2147483647, %v1646_v49  ;;  %v777_v42 = vmax.f32 %v1646_v49, 0.0  ;;  %vm1017_vm14 = vcmp.gt.f32.partialorder %v1646_v49, 20.0 }
 0x27a   : > { %v998_v52 = vadd.f32 %v926_v51, %v774_v50  ;;  %v932_v3 = vmul.f32 %v1252_v40, %v931_v53 }
 0x27b   : > { %v809_v54 = vsub.f32 0.0, %v793_v38 }
 0x27c   : > { %v1030_v55 = vsel %vm1014_vm8, %v1610_v56, %v998_v52 }
 0x27d   : > { %v1256_v58 = vpop.eup %1255  ;;  %v1046_v45 = vsel %vm765_vm4, %v1030_v55, %v1610_v56  ;;  %v836_v59 = vmul.f32 1.442695, %v809_v54 }
 0x27e   : > { %v1258_v60 = vpop.eup %1257  ;;  %1063 = vst.msk [vmem:[%s1555_s25 + $0x40] sm:$0xff] %vm1054_vm6, %v1046_v45  ;;  %v936_v62 = vadd.f32 1.0, %v1256_v58  ;;  %v939_v63 = vmul.f32 -0.5, %v1256_v58  ;;  %v751_v1 = vpop.f32.mrf.mxu3  ;;  %v942_v13 = vand.u32 2147483647, %v1256_v58 }
 0x27f   : > { %v929_v2 = vmul.f32 0.6931472, %v1258_v60  ;;  %1259 = vpow2.f32 %v836_v59  ;;  %v1658_v4 = vadd.f32 %v1532_v61, %v751_v1 }
 0x280   : > { %1261 = vlog2.f32 %v936_v62  ;;  %v940_v8 = vadd.f32 1.0, %v939_v63  ;;  %vm943_vm11 = vcmp.lt.f32.partialorder %v942_v13, 0.0004427343 }
 0x281   : > { %v935_v6 = vsel %vm934_vm9, %v932_v3, %v929_v2  ;;  %v794_v56 = vand.u32 2147483647, %v1658_v4  ;;  %v778_v60 = vmax.f32 %v1658_v4, 0.0  ;;  %vm1018_vm0 = vcmp.gt.f32.partialorder %v1658_v4, 20.0 }
 0x282   : > { %v999_v7 = vadd.f32 %v935_v6, %v775_v5  ;;  %v941_v17 = vmul.f32 %v1256_v58, %v940_v8 }
 0x283   : > { %v810_v9 = vsub.f32 0.0, %v794_v56 }
 0x284   : > { %v1031_v10 = vsel %vm1015_vm10, %v1622_v11, %v999_v7 }
 0x285   : > { %v1260_v14 = vpop.eup %1259  ;;  %v1047_v0 = vsel %vm765_vm4, %v1031_v10, %v1622_v11  ;;  %v838_v15 = vmul.f32 1.442695, %v810_v9 }
 0x286   : > { %v1262_v16 = vpop.eup %1261  ;;  %1064 = vst.msk [vmem:[%s1555_s25 + $0x48] sm:$0xff] %vm1054_vm6, %v1047_v0  ;;  %v945_v18 = vadd.f32 1.0, %v1260_v14  ;;  %v754_v20 = vpop.f32.mrf.mxu3  ;;  %v948_v12 = vmul.f32 -0.5, %v1260_v14  ;;  %v951_v32 = vand.u32 2147483647, %v1260_v14 }
 0x287   : > { %v938_v22 = vmul.f32 0.6931472, %v1262_v16  ;;  %1263 = vpow2.f32 %v838_v15  ;;  %v1670_v23 = vadd.f32 %v1532_v61, %v754_v20 }
 0x288   : > { %1265 = vlog2.f32 %v945_v18  ;;  %v949_v28 = vadd.f32 1.0, %v948_v12  ;;  %vm952_vm13 = vcmp.lt.f32.partialorder %v951_v32, 0.0004427343 }
 0x289   : > { %v944_v25 = vsel %vm943_vm11, %v941_v17, %v938_v22  ;;  %v795_v11 = vand.u32 2147483647, %v1670_v23  ;;  %vm1019_vm2 = vcmp.gt.f32.partialorder %v1670_v23, 20.0 }
 0x28a   : > { %v1000_v26 = vadd.f32 %v944_v25, %v776_v24  ;;  %v950_v27 = vmul.f32 %v1260_v14, %v949_v28  ;;  %v779_v14 = vmax.f32 %v1670_v23, 0.0 }
 0x28b   : > { %v811_v29 = vsub.f32 0.0, %v795_v11 }
 0x28c   : > { %v1032_v30 = vsel %vm1016_vm12, %v1634_v31, %v1000_v26 }
 0x28d   : > { %v1264_v33 = vpop.eup %1263  ;;  %v1048_v19 = vsel %vm765_vm4, %v1032_v30, %v1634_v31  ;;  %v840_v34 = vmul.f32 1.442695, %v811_v29 }
 0x28e   : > { %v1266_v35 = vpop.eup %1265  ;;  %1065 = vst.msk [vmem:[%s1555_s25 + $0x50] sm:$0xff] %vm1054_vm6, %v1048_v19  ;;  %v954_v36 = vadd.f32 1.0, %v1264_v33  ;;  %v957_v37 = vmul.f32 -0.5, %v1264_v33  ;;  %v757_v39 = vpop.f32.mrf.mxu3  ;;  %v960_v50 = vand.u32 2147483647, %v1264_v33 }
 0x28f   : > { %v947_v40 = vmul.f32 0.6931472, %v1266_v35  ;;  %1267 = vpow2.f32 %v840_v34  ;;  %v1682_v41 = vadd.f32 %v1532_v61, %v757_v39 }
 0x290   : > { %1269 = vlog2.f32 %v954_v36  ;;  %v958_v46 = vadd.f32 1.0, %v957_v37  ;;  %vm961_vm15 = vcmp.lt.f32.partialorder %v960_v50, 0.0004427343 }
 0x291   : > { %v953_v43 = vsel %vm952_vm13, %v950_v27, %v947_v40  ;;  %v796_v31 = vand.u32 2147483647, %v1682_v41  ;;  %v780_v26 = vmax.f32 %v1682_v41, 0.0  ;;  %vm1020_vm5 = vcmp.gt.f32.partialorder %v1682_v41, 20.0 }
 0x292   : > { %v1001_v44 = vadd.f32 %v953_v43, %v777_v42  ;;  %v959_v54 = vmul.f32 %v1264_v33, %v958_v46 }
 0x293   : > { %v812_v47 = vsub.f32 0.0, %v796_v31 }
 0x294   : > { %v1033_v48 = vsel %vm1017_vm14, %v1646_v49, %v1001_v44 }
 0x295   : > { %v1268_v51 = vpop.eup %1267  ;;  %v1049_v38 = vsel %vm765_vm4, %v1033_v48, %v1646_v49  ;;  %v842_v52 = vmul.f32 1.442695, %v812_v47 }
 0x296   : > { %v1270_v53 = vpop.eup %1269  ;;  %1066 = vst.msk [vmem:[%s1555_s25 + $0x58] sm:$0xff] %vm1054_vm6, %v1049_v38  ;;  %v963_v55 = vadd.f32 1.0, %v1268_v51  ;;  %v760_v57 = vpop.f32.mrf.mxu3  ;;  %v966_v45 = vmul.f32 -0.5, %v1268_v51  ;;  %v969_v5 = vand.u32 2147483647, %v1268_v51 }
 0x297   : > { %v956_v58 = vmul.f32 0.6931472, %v1270_v53  ;;  %1271 = vpow2.f32 %v842_v52  ;;  %v761_v59 = vadd.f32 %v1532_v61, %v760_v57 }
 0x298   : > { %1273 = vlog2.f32 %v963_v55  ;;  %v967_v1 = vadd.f32 1.0, %v966_v45  ;;  %vm970_vm1 = vcmp.lt.f32.partialorder %v969_v5, 0.0004427343 }
 0x299   : > { %v962_v62 = vsel %vm961_vm15, %v959_v54, %v956_v58  ;;  %v797_v63 = vand.u32 2147483647, %v761_v59  ;;  %v781_v36 = vmax.f32 %v761_v59, 0.0  ;;  %vm1021_vm8 = vcmp.gt.f32.partialorder %v761_v59, 20.0 }
 0x29a   : > { %v1002_v49 = vadd.f32 %v962_v62, %v778_v60  ;;  %v968_v10 = vmul.f32 %v1268_v51, %v967_v1 }
 0x29b   : > { %v813_v2 = vsub.f32 0.0, %v797_v63 }
 0x29c   : > { %v1034_v3 = vsel %vm1018_vm0, %v1658_v4, %v1002_v49 }
 0x29d   : > { %v1272_v6 = vpop.eup %1271  ;;  %v1050_v61 = vsel %vm765_vm4, %v1034_v3, %v1658_v4  ;;  %v844_v56 = vmul.f32 1.442695, %v813_v2 }
 0x29e   : > { %v1274_v7 = vpop.eup %1273  ;;  %1067 = vst.msk [vmem:[%s1555_s25 + $0x60] sm:$0xff] %vm1054_vm6, %v1050_v61  ;;  %v972_v8 = vadd.f32 1.0, %v1272_v6  ;;  %v975_v13 = vmul.f32 -0.5, %v1272_v6  ;;  %v978_v17 = vand.u32 2147483647, %v1272_v6 }
 0x29f   : > { %v965_v9 = vmul.f32 0.6931472, %v1274_v7  ;;  %1275 = vpow2.f32 %v844_v56 }
 0x2a0   : > { %1277 = vlog2.f32 %v972_v8  ;;  %v976_v16 = vadd.f32 1.0, %v975_v13  ;;  %vm979_vm3 = vcmp.lt.f32.partialorder %v978_v17, 0.0004427343 }
 0x2a1   : > { %v971_v0 = vsel %vm970_vm1, %v968_v10, %v965_v9 }
 0x2a2   : > { %v1003_v15 = vadd.f32 %v971_v0, %v779_v14  ;;  %v977_v25 = vmul.f32 %v1272_v6, %v976_v16 }
 0x2a4   : > { %v1035_v4 = vsel %vm1019_vm2, %v1670_v23, %v1003_v15 }
 0x2a5   : > { %v1276_v18 = vpop.eup %1275  ;;  %v1051_v20 = vsel %vm765_vm4, %v1035_v4, %v1670_v23 }
 0x2a6   : > { %v1278_v22 = vpop.eup %1277  ;;  %1068 = vst.msk [vmem:[%s1555_s25 + $0x68] sm:$0xff] %vm1054_vm6, %v1051_v20  ;;  %v981_v12 = vadd.f32 1.0, %v1276_v18  ;;  %v984_v11 = vmul.f32 -0.5, %v1276_v18  ;;  %v987_v32 = vand.u32 2147483647, %v1276_v18 }
 0x2a7   : > { %v974_v24 = vmul.f32 0.6931472, %v1278_v22 }
 0x2a8   : > { %1279 = vlog2.f32 %v981_v12  ;;  %v985_v30 = vadd.f32 1.0, %v984_v11  ;;  %vm988_vm7 = vcmp.lt.f32.partialorder %v987_v32, 0.0004427343 }
 0x2a9   : > { %v980_v28 = vsel %vm979_vm3, %v977_v25, %v974_v24 }
 0x2aa   : > { %v1004_v29 = vadd.f32 %v980_v28, %v780_v26  ;;  %v986_v35 = vmul.f32 %v1276_v18, %v985_v30 }
 0x2ac   : > { %v1036_v23 = vsel %vm1020_vm5, %v1682_v41, %v1004_v29 }
 0x2ad   : > { %v1052_v33 = vsel %vm765_vm4, %v1036_v23, %v1682_v41 }
 0x2ae   : > { %v1280_v19 = vpop.eup %1279  ;;  %1069 = vst.msk [vmem:[%s1555_s25 + $0x70] sm:$0xff] %vm1054_vm6, %v1052_v33 }
 0x2af   : > { %v983_v34 = vmul.f32 0.6931472, %v1280_v19 }
 0x2b1   : > { %v989_v37 = vsel %vm988_vm7, %v986_v35, %v983_v34 }
 0x2b2   : > { %v1005_v39 = vadd.f32 %v989_v37, %v781_v36 }
 0x2b4   : > { %v1037_v40 = vsel %vm1021_vm8, %v761_v59, %v1005_v39 }
 0x2b5   : > { %v1053_v27 = vsel %vm765_vm4, %v1037_v40, %v761_v59 }
 0x2b6   : > { %1070 = vst.msk [vmem:[%s1555_s25 + $0x78] sm:$0xff] %vm1054_vm6, %v1053_v27 }
 0x2b7 PF: > { %s16_s21 = sadd.s32 1, %s1287_s21  }
 0x2b8   : > { %p13_p4 = scmp.ge.s32.totalorder %s16_s21, 4  }
 0x2ba   :  { %15 = sbr.rel (!%p13_p4) target bundleno = 1 (0x1), region = 74 }

</bundles_post_ra>
